<compile_context>
chip_gen: v7x
topology: tpu7x:2x2x1
jax: 0.10.0
libtpu: 0.0.40
codegen_flags: <defaults>
</compile_context>

<pallas_src>
import math
import functools

import jax
import jax.numpy as jnp
from jax.experimental import pallas as pl
from jax.experimental.pallas import tpu as pltpu


def _rel_pos_copy_kernel(slab_ref, out_ref, *, seq_len_q, pack):
    # slab_ref: (Q + K - pack, pack*D)  -- fully resident in VMEM.
    # out_ref : (tq, tkb, pack*D)       -- output block for grid point (gi, gj).
    # out_ref[i, t, :] = slab_ref[(kb0 + t)*pack - (q0 + i) + (Q - 1), :]
    tq, tkb, _ = out_ref.shape
    q0 = pl.program_id(0) * tq
    kb0 = pl.program_id(1) * tkb
    base = kb0 * pack + (seq_len_q - 1) - q0        # slab row for (i=0, t=0)

    def copy_row(i):
        start = base - i
        if pack > 1:
            out_ref[i] = slab_ref[pl.ds(start, tkb, stride=pack), :]
        else:
            out_ref[i] = slab_ref[pl.ds(start, tkb), :]

    if tq <= 16:
        # Fully unrolled at trace time: gives the scheduler cross-row visibility.
        for i in range(tq):
            copy_row(i)
    else:
        @pl.loop(0, tq)
        def _(i):
            copy_row(i)


def _round_up(x, m):
    return -(-x // m) * m


def _choose_tiles(seq_len_q, kb, lane_width, itemsize, slab_rows, *,
                  slab_buffers=1, total_budget=28 << 20, block_budget=8 << 20):
    """Pick (tq, tkb) for output blocks of shape (tq, tkb, lane_width).

    Budgets lane-padded VMEM for: slab (x slab_buffers) + 2x output block
    (pipeline double-buffer).  total_budget ~28 MiB keeps every generation
    (incl. v7x's 64 MiB physical / 32 MiB scoped) safe once vmem_limit_bytes
    is raised to >= 32 MiB.
    """
    row_cost = _round_up(lane_width, 128) * itemsize            # lane padding
    sub = max(8, 32 // itemsize)                                # sublane granularity per dtype
    slab_cost = _round_up(slab_rows, sub) * row_cost * slab_buffers

    remaining = max(total_budget - slab_cost, 2 << 20)
    per_block = max(min(block_budget, remaining // 2), row_cost)
    max_rows = max(1, per_block // row_cost)                    # budget for tq * tkb rows

    # tkb is the second-to-last block dim: multiple of `sub`, or the full extent.
    tkb_candidates = [d for d in range(kb, 0, -1)
                      if kb % d == 0 and (d == kb or d % sub == 0)]
    tkb = next((d for d in tkb_candidates if d <= max_rows), tkb_candidates[-1])

    tq_cap = max(1, max_rows // tkb)
    tq_divs = [d for d in range(min(seq_len_q, tq_cap), 0, -1) if seq_len_q % d == 0]
    if (kb // tkb) % 2 == 0:
        tq = tq_divs[0]
    else:
        # Prefer an even total grid-step count so v7x's two TensorCores stay balanced.
        tq = next((d for d in tq_divs if (seq_len_q // d) % 2 == 0), tq_divs[0])

    block_cost = tq * tkb * row_cost
    needed = slab_cost + 2 * block_cost + (2 << 20)
    vmem_limit = int(min(max(needed, 32 << 20), 96 << 20))
    return tq, tkb, vmem_limit


def relative_positional_encoder(embeddings_table, seq_len_q, seq_len_k, max_position):
    """Pallas version of RelativePositionalEncoder.forward(seq_len_q, seq_len_k)."""
    T, D = embeddings_table.shape
    assert T == 2 * max_position + 1
    dtype = embeddings_table.dtype
    itemsize = jnp.dtype(dtype).itemsize

    # slab[m] = table[clamp(m - (Q-1), -P, P) + P];  out[i, j] = slab[j - i + (Q-1)].
    m = jnp.arange(seq_len_q + seq_len_k - 1)
    slab_idx = jnp.clip(m - (seq_len_q - 1), -max_position, max_position) + max_position
    slab = embeddings_table[slab_idx]                           # (Q + K - 1, D)

    # Lane-dense packing factor: p adjacent k-positions share one 128-lane row.
    pack = 1
    if D < 128 and 128 % D == 0:
        pack = 128 // D                                         # power of two
        while pack > 1 and seq_len_k % pack:
            pack //= 2

    def run(p, slab_whole_vmem):
        slab_rows = seq_len_q + seq_len_k - p
        if p > 1:
            rows = jnp.arange(slab_rows)[:, None] + jnp.arange(p)[None, :]
            slab_in = slab[rows].reshape(slab_rows, p * D)      # (Q+K-p, p*D)
        else:
            slab_in = slab
        kb = seq_len_k // p
        lane = p * D

        tq, tkb, vmem_limit = _choose_tiles(
            seq_len_q, kb, lane, itemsize, slab_rows,
            slab_buffers=1 if slab_whole_vmem else 2)

        if slab_whole_vmem:
            # Whole slab resident in VMEM, single buffer (not pipelined).
            slab_spec = pl.BlockSpec(memory_space=pltpu.MemorySpace.VMEM)
        else:
            # Previously-validated configuration: constant index_map (fetched once,
            # but pipeline allocates the default 2 buffers).
            slab_spec = pl.BlockSpec((slab_rows, lane), lambda i, j: (0, 0))

        kernel = functools.partial(_rel_pos_copy_kernel, seq_len_q=seq_len_q, pack=p)

        out_packed = pl.pallas_call(
            kernel,
            out_shape=jax.ShapeDtypeStruct((seq_len_q, kb, lane), dtype),
            grid_spec=pltpu.PrefetchScalarGridSpec(
                num_scalar_prefetch=0,
                grid=(seq_len_q // tq, kb // tkb),
                in_specs=[slab_spec],
                out_specs=pl.BlockSpec((tq, tkb, lane), lambda i, j: (i, j, 0)),
            ),
            compiler_params=pltpu.CompilerParams(
                dimension_semantics=("parallel", "parallel"),
                vmem_limit_bytes=vmem_limit),
            cost_estimate=pl.CostEstimate(
                flops=0, transcendentals=0,
                bytes_accessed=(seq_len_q * seq_len_k * D + slab_rows * lane) * itemsize),
        )(slab_in)
        # (Q, K//p, p*D) -> (Q, K, D) is the identical row-major HBM layout (free).
        return out_packed.reshape(seq_len_q, seq_len_k, D)

    try:
        return run(pack, True)
    except Exception:  # noqa: BLE001
        # TODO(synk): conservative fallback (unpacked, pipelined slab) in case the
        # strided-read / resident-slab configuration fails to lower on this jax build.
        return run(1, False)


def _xavier_uniform(key, shape, dtype=jnp.float32):
    # PyTorch xavier_uniform_ on a 2-D tensor: (fan_out, fan_in) = shape
    fan_out, fan_in = shape
    a = math.sqrt(6.0 / (fan_in + fan_out))
    return jax.random.uniform(key, shape, dtype=dtype, minval=-a, maxval=a)


def _reference(table, seq_len_q, seq_len_k, max_position):
    rel = jnp.clip(jnp.arange(seq_len_k)[None, :] - jnp.arange(seq_len_q)[:, None],
                   -max_position, max_position) + max_position
    return table[rel]


if __name__ == "__main__":
    key = jax.random.PRNGKey(0)
    k1, k2 = jax.random.split(key)

    # Case 1: emb_dim=32 < 128 -> lane-dense packed path (p = 4), square Q=K=8.
    emb_dim, max_position, seq_len_q, seq_len_k = 32, 4, 8, 8
    table = _xavier_uniform(k1, (2 * max_position + 1, emb_dim))
    out = jax.block_until_ready(
        relative_positional_encoder(table, seq_len_q, seq_len_k, max_position))
    ref = _reference(table, seq_len_q, seq_len_k, max_position)
    assert out.shape == (seq_len_q, seq_len_k, emb_dim)
    assert jnp.allclose(out, ref, atol=1e-6), "mismatch vs reference (packed, square)"

    # Case 2: rectangular K (still packed).
    seq_len_k2 = 16
    out2 = jax.block_until_ready(
        relative_positional_encoder(table, seq_len_q, seq_len_k2, max_position))
    assert jnp.allclose(out2, _reference(table, seq_len_q, seq_len_k2, max_position),
                        atol=1e-6), "mismatch vs reference (packed, rect)"

    # Case 3: emb_dim=128 -> already lane-dense, unpacked (p = 1) path.
    table128 = _xavier_uniform(k2, (2 * max_position + 1, 128))
    out3 = jax.block_until_ready(
        relative_positional_encoder(table128, seq_len_q, seq_len_k, max_position))
    assert jnp.allclose(out3, _reference(table128, seq_len_q, seq_len_k, max_position),
                        atol=1e-6), "mismatch vs reference (unpacked)"

    print("KERNEL_OK")
</pallas_src>

<mosaic_0001>
module attributes {stable_mosaic.version = 11 : i64} {
  func.func @_rel_pos_copy_kernel(%arg0: i32, %arg1: i32, %arg2: memref<12x128xf32, #tpu.memory_space<vmem>>, %arg3: memref<4x2x128xf32, #tpu.memory_space<vmem>>) attributes {dimension_semantics = [#tpu.dimension_semantics<parallel>, #tpu.dimension_semantics<parallel>], iteration_bounds = array<i64: 2, 1>, scalar_prefetch = 0 : i64, scratch_operands = 0 : i64, tpu.core_type = #tpu.core_type<tc>, window_params = [{pipeline_mode = #tpu.pipeline_mode<synchronous>, transform_indices = @transform_0, window_bounds = array<i64: 12, 128>}, {transform_indices = @transform_1, window_bounds = array<i64: 4, 2, 128>}]} {
    %c4_i32 = arith.constant 4 : i32
    %0 = arith.muli %arg0, %c4_i32 : i32
    %c2_i32 = arith.constant 2 : i32
    %1 = arith.muli %arg1, %c2_i32 : i32
    %c4_i32_0 = arith.constant 4 : i32
    %2 = arith.muli %1, %c4_i32_0 : i32
    %c7_i32 = arith.constant 7 : i32
    %3 = arith.addi %2, %c7_i32 : i32
    %4 = arith.subi %3, %0 : i32
    %c0_i32 = arith.constant 0 : i32
    %5 = arith.subi %4, %c0_i32 : i32
    %6 = arith.index_cast %5 : i32 to index
    %c0 = arith.constant 0 : index
    %7 = tpu.strided_load %arg2[%6, %c0] {strides = array<i32: 4, 1>} : memref<12x128xf32, #tpu.memory_space<vmem>>, vector<2x128xf32>
    %c0_1 = arith.constant 0 : index
    %c0_2 = arith.constant 0 : index
    %c0_3 = arith.constant 0 : index
    %8 = vector.load %arg3[%c0_1, %c0_2, %c0_3] : memref<4x2x128xf32, #tpu.memory_space<vmem>>, vector<1x2x128xf32>
    %9 = vector.shape_cast %8 : vector<1x2x128xf32> to vector<2x128xf32>
    %10 = vector.shape_cast %7 : vector<2x128xf32> to vector<1x2x128xf32>
    tpu.vector_store %arg3[%c0_1, %c0_2, %c0_3], %10 {strides = array<i32>} : memref<4x2x128xf32, #tpu.memory_space<vmem>>, vector<1x2x128xf32>,
    %c1_i32 = arith.constant 1 : i32
    %11 = arith.subi %4, %c1_i32 : i32
    %12 = arith.index_cast %11 : i32 to index
    %c0_4 = arith.constant 0 : index
    %13 = tpu.strided_load %arg2[%12, %c0_4] {strides = array<i32: 4, 1>} : memref<12x128xf32, #tpu.memory_space<vmem>>, vector<2x128xf32>
    %c1 = arith.constant 1 : index
    %c0_5 = arith.constant 0 : index
    %c0_6 = arith.constant 0 : index
    %14 = vector.load %arg3[%c1, %c0_5, %c0_6] : memref<4x2x128xf32, #tpu.memory_space<vmem>>, vector<1x2x128xf32>
    %15 = vector.shape_cast %14 : vector<1x2x128xf32> to vector<2x128xf32>
    %16 = vector.shape_cast %13 : vector<2x128xf32> to vector<1x2x128xf32>
    tpu.vector_store %arg3[%c1, %c0_5, %c0_6], %16 {strides = array<i32>} : memref<4x2x128xf32, #tpu.memory_space<vmem>>, vector<1x2x128xf32>,
    %c2_i32_7 = arith.constant 2 : i32
    %17 = arith.subi %4, %c2_i32_7 : i32
    %18 = arith.index_cast %17 : i32 to index
    %c0_8 = arith.constant 0 : index
    %19 = tpu.strided_load %arg2[%18, %c0_8] {strides = array<i32: 4, 1>} : memref<12x128xf32, #tpu.memory_space<vmem>>, vector<2x128xf32>
    %c2 = arith.constant 2 : index
    %c0_9 = arith.constant 0 : index
    %c0_10 = arith.constant 0 : index
    %20 = vector.load %arg3[%c2, %c0_9, %c0_10] : memref<4x2x128xf32, #tpu.memory_space<vmem>>, vector<1x2x128xf32>
    %21 = vector.shape_cast %20 : vector<1x2x128xf32> to vector<2x128xf32>
    %22 = vector.shape_cast %19 : vector<2x128xf32> to vector<1x2x128xf32>
    tpu.vector_store %arg3[%c2, %c0_9, %c0_10], %22 {strides = array<i32>} : memref<4x2x128xf32, #tpu.memory_space<vmem>>, vector<1x2x128xf32>,
    %c3_i32 = arith.constant 3 : i32
    %23 = arith.subi %4, %c3_i32 : i32
    %24 = arith.index_cast %23 : i32 to index
    %c0_11 = arith.constant 0 : index
    %25 = tpu.strided_load %arg2[%24, %c0_11] {strides = array<i32: 4, 1>} : memref<12x128xf32, #tpu.memory_space<vmem>>, vector<2x128xf32>
    %c3 = arith.constant 3 : index
    %c0_12 = arith.constant 0 : index
    %c0_13 = arith.constant 0 : index
    %26 = vector.load %arg3[%c3, %c0_12, %c0_13] : memref<4x2x128xf32, #tpu.memory_space<vmem>>, vector<1x2x128xf32>
    %27 = vector.shape_cast %26 : vector<1x2x128xf32> to vector<2x128xf32>
    %28 = vector.shape_cast %25 : vector<2x128xf32> to vector<1x2x128xf32>
    tpu.vector_store %arg3[%c3, %c0_12, %c0_13], %28 {strides = array<i32>} : memref<4x2x128xf32, #tpu.memory_space<vmem>>, vector<1x2x128xf32>,
    return
  }
  func.func @transform_0(%arg0: i32, %arg1: i32) -> (i32, i32) {
    %c0_i32 = arith.constant 0 : i32
    %c0_i32_0 = arith.constant 0 : i32
    %c0_i32_1 = arith.constant 0 : i32
    return %c0_i32, %c0_i32_0 : i32, i32
  }
  func.func @transform_1(%arg0: i32, %arg1: i32) -> (i32, i32, i32) {
    %c0_i32 = arith.constant 0 : i32
    %c0_i32_0 = arith.constant 0 : i32
    return %arg0, %arg1, %c0_i32 : i32, i32, i32
  }
}

module attributes {stable_mosaic.version = 11 : i64} {
  func.func @_rel_pos_copy_kernel(%arg0: i32, %arg1: i32, %arg2: memref<15x32xf32, #tpu.memory_space<vmem>>, %arg3: memref<4x8x32xf32, #tpu.memory_space<vmem>>) attributes {dimension_semantics = [#tpu.dimension_semantics<parallel>, #tpu.dimension_semantics<parallel>], iteration_bounds = array<i64: 2, 1>, scalar_prefetch = 0 : i64, scratch_operands = 0 : i64, tpu.core_type = #tpu.core_type<tc>, window_params = [{pipeline_mode = #tpu.pipeline_mode<synchronous>, transform_indices = @transform_0, window_bounds = array<i64: 15, 32>}, {transform_indices = @transform_1, window_bounds = array<i64: 4, 8, 32>}]} {
    %c4_i32 = arith.constant 4 : i32
    %0 = arith.muli %arg0, %c4_i32 : i32
    %c8_i32 = arith.constant 8 : i32
    %1 = arith.muli %arg1, %c8_i32 : i32
    %c1_i32 = arith.constant 1 : i32
    %2 = arith.muli %1, %c1_i32 : i32
    %c7_i32 = arith.constant 7 : i32
    %3 = arith.addi %2, %c7_i32 : i32
    %4 = arith.subi %3, %0 : i32
    %c0_i32 = arith.constant 0 : i32
    %5 = arith.subi %4, %c0_i32 : i32
    %6 = arith.index_cast %5 : i32 to index
    %c0 = arith.constant 0 : index
    %7 = vector.load %arg2[%6, %c0] : memref<15x32xf32, #tpu.memory_space<vmem>>, vector<8x32xf32>
    %c0_0 = arith.constant 0 : index
    %c0_1 = arith.constant 0 : index
    %c0_2 = arith.constant 0 : index
    %8 = vector.load %arg3[%c0_0, %c0_1, %c0_2] : memref<4x8x32xf32, #tpu.memory_space<vmem>>, vector<1x8x32xf32>
    %9 = vector.shape_cast %8 : vector<1x8x32xf32> to vector<8x32xf32>
    %10 = vector.shape_cast %7 : vector<8x32xf32> to vector<1x8x32xf32>
    tpu.vector_store %arg3[%c0_0, %c0_1, %c0_2], %10 {strides = array<i32>} : memref<4x8x32xf32, #tpu.memory_space<vmem>>, vector<1x8x32xf32>,
    %c1_i32_3 = arith.constant 1 : i32
    %11 = arith.subi %4, %c1_i32_3 : i32
    %12 = arith.index_cast %11 : i32 to index
    %c0_4 = arith.constant 0 : index
    %13 = vector.load %arg2[%12, %c0_4] : memref<15x32xf32, #tpu.memory_space<vmem>>, vector<8x32xf32>
    %c1 = arith.constant 1 : index
    %c0_5 = arith.constant 0 : index
    %c0_6 = arith.constant 0 : index
    %14 = vector.load %arg3[%c1, %c0_5, %c0_6] : memref<4x8x32xf32, #tpu.memory_space<vmem>>, vector<1x8x32xf32>
    %15 = vector.shape_cast %14 : vector<1x8x32xf32> to vector<8x32xf32>
    %16 = vector.shape_cast %13 : vector<8x32xf32> to vector<1x8x32xf32>
    tpu.vector_store %arg3[%c1, %c0_5, %c0_6], %16 {strides = array<i32>} : memref<4x8x32xf32, #tpu.memory_space<vmem>>, vector<1x8x32xf32>,
    %c2_i32 = arith.constant 2 : i32
    %17 = arith.subi %4, %c2_i32 : i32
    %18 = arith.index_cast %17 : i32 to index
    %c0_7 = arith.constant 0 : index
    %19 = vector.load %arg2[%18, %c0_7] : memref<15x32xf32, #tpu.memory_space<vmem>>, vector<8x32xf32>
    %c2 = arith.constant 2 : index
    %c0_8 = arith.constant 0 : index
    %c0_9 = arith.constant 0 : index
    %20 = vector.load %arg3[%c2, %c0_8, %c0_9] : memref<4x8x32xf32, #tpu.memory_space<vmem>>, vector<1x8x32xf32>
    %21 = vector.shape_cast %20 : vector<1x8x32xf32> to vector<8x32xf32>
    %22 = vector.shape_cast %19 : vector<8x32xf32> to vector<1x8x32xf32>
    tpu.vector_store %arg3[%c2, %c0_8, %c0_9], %22 {strides = array<i32>} : memref<4x8x32xf32, #tpu.memory_space<vmem>>, vector<1x8x32xf32>,
    %c3_i32 = arith.constant 3 : i32
    %23 = arith.subi %4, %c3_i32 : i32
    %24 = arith.index_cast %23 : i32 to index
    %c0_10 = arith.constant 0 : index
    %25 = vector.load %arg2[%24, %c0_10] : memref<15x32xf32, #tpu.memory_space<vmem>>, vector<8x32xf32>
    %c3 = arith.constant 3 : index
    %c0_11 = arith.constant 0 : index
    %c0_12 = arith.constant 0 : index
    %26 = vector.load %arg3[%c3, %c0_11, %c0_12] : memref<4x8x32xf32, #tpu.memory_space<vmem>>, vector<1x8x32xf32>
    %27 = vector.shape_cast %26 : vector<1x8x32xf32> to vector<8x32xf32>
    %28 = vector.shape_cast %25 : vector<8x32xf32> to vector<1x8x32xf32>
    tpu.vector_store %arg3[%c3, %c0_11, %c0_12], %28 {strides = array<i32>} : memref<4x8x32xf32, #tpu.memory_space<vmem>>, vector<1x8x32xf32>,
    return
  }
  func.func @transform_0(%arg0: i32, %arg1: i32) -> (i32, i32) {
    %c0_i32 = arith.constant 0 : i32
    %c0_i32_0 = arith.constant 0 : i32
    %c0_i32_1 = arith.constant 0 : i32
    return %c0_i32, %c0_i32_0 : i32, i32
  }
  func.func @transform_1(%arg0: i32, %arg1: i32) -> (i32, i32, i32) {
    %c0_i32 = arith.constant 0 : i32
    %c0_i32_0 = arith.constant 0 : i32
    return %arg0, %arg1, %c0_i32 : i32, i32, i32
  }
}

</mosaic_0001>

<bundles_post_ra>
// kernel: tpu_custom_call.1
= control target key start
LH: loop header
LB: loop body
LE: loop exit
PB: predicated region body
PF: predicated region fallthrough
CT: control target
= control target key end

     0   :  { %6 = vsyncpa [#allocation3], 0  ;;  %s617_s0 = inlined_call_operand.hbm [shape: f32[12,128], index: 0, kind: input, shape index: {}]   ;;  %s618_s1 = inlined_call_operand.hbm [shape: f32[8,2,128], index: 1, kind: output, shape index: {}]  }
   0x1   :  { %7 = vsyncpa [#allocation4], 0 }
   0x2   :  { %9 = vsyncpa [#allocation4 + $0x1], 0  ;;  %s468_s6 = smov 0   ;;  %s470_s7 = smov 0  }
   0x3   :  { %s472_s8 = smov 0   ;;  %s474_s9 = smov 0  }
   0x4   :  { %s476_s10 = smov 0   ;;  %s478_s11 = smov 0  }
   0x5 LB: > { %s238_s12 = sadd.s32 4294967295, %s450_s11   ;;  %s239_s13 = sadd.s32 4294967294, %s450_s11   ;;  %s450_s11 = sphi %s478_s11, %s15_s11   ;;  %s446_s10 = sphi %s476_s10, %s636_s10   ;;  %s442_s9 = sphi %s474_s9, %s635_s9   ;;  %s438_s8 = sphi %s472_s8, %s634_s8   ;;  %s434_s7 = sphi %s470_s7, %s633_s7   ;;  %s430_s6 = sphi %s468_s6, %s632_s6  }
   0x6   : > { %s27_s14 = sadd.s32 1, %s446_s10  ;;  %s57_s15 = sadd.s32 1, %s438_s8 }
   0x7   : > { %p29_p0 = scmp.ge.s32.totalorder %s27_s14, 2  ;;  %p67_p1 = scmp.ne.s32.totalorder %s438_s8, %s434_s7 }
   0x8   : > { %p68_p2 = scmp.eq.s32.totalorder %s238_s12, 1  ;;  %p73_p3 = scmp.ne.s32.totalorder %s434_s7, %s430_s6 }
   0x9   : > { %s638_s14 = smov (%p29_p0, %s27_s14), 0  ;;  %p74_p5 = scmp.eq.s32.totalorder %s239_s13, 1 }
   0xa   : > { %p508_p4 = por %p68_p2, %p67_p1  ;;  %s52_s17 = ssub.s32 %s446_s10, %s638_s14 }
   0xb   : > { %p240_p6 = scmp.ge.s32.totalorder %s450_s11, 1  ;;  %p55_p7 = scmp.eq.s32.totalorder %s52_s17, 0 }
   0xc   : > { %s623_s16 = scalar_select %p508_p4, 1, 0 }
   0xd   : > { %p515_p8 = por %p74_p5, %p73_p3  ;;  %p81_p9 = scmp.lt.s32.totalorder %s450_s11, 3 }
   0xe   : > { %s521_s19 = scalar_select %p55_p7, %s438_s8, %s57_s15  }
   0xf   : > { %s624_s18 = scalar_select %p515_p8, 1, 0 }
  0x10   : > { %p523_p10 = pnand %p240_p6, %p81_p9  ;;  %p527_p11 = scmp.eq.s32.totalorder %s238_s12, 0 }
  0x11   : > { %s452_s22 = smov [#allocation2]   ;;  %s340_s27 = scalar_lea.hbm %s617_s0, 256 }
  0x12   : > { %s625_s20 = scalar_select %p523_p10, 1, 0 }
  0x13   : > { %s626_s21 = scalar_select %p527_p11, 1, 0 }
  0x14   : > { %p276_p12 = pneg %p523_p10  ;;  %s93_s23 = sshll.u32 %s452_s22, 4  ;;  %s94_s23 = int_to_ptr.vmem [resolvable:$true] %s93_s23 }
  0x15   : > { %p341_p0 = scmp.ne.s32.totalorder %s617_s0, %s340_s27  ;;  %p347_p5 = scmp.lt.u32.totalorder %s340_s27, %s617_s0 }
  0x16   : > { %p535_p13 = pnand %p527_p11, %p276_p12 }
  0x18   : > { %p342_p1 = pneg %p535_p13 }
  0x1a   : > { %p343_p2 = pnand %p342_p1, %p341_p0 }
  0x1c   : > { %p344_p3 = pneg %p343_p2 }
  0x1e   : > { %p349_p6 = pnand %p347_p5, %p344_p3 }
  0x20   : > { %352 = shalt.err (!%p349_p6)
}
  0x21   : > { %s353_s3 = scalar_lea.vmem %s94_s23, 256  ;;  %p361_p8 = scmp.lt.s32.totalorder %s94_s23, %s94_s23 }
  0x22   : > { %p354_p7 = scmp.ne.s32.totalorder %s94_s23, %s353_s3  ;;  %p362_p4 = scmp.lt.s32.totalorder %s353_s3, %s353_s3 }
  0x24   : > { %p356_p9 = pnand %p354_p7, %p342_p1  ;;  %p363_p11 = por %p362_p4, %p361_p8 }
  0x26   : > { %p357_p12 = pneg %p356_p9 }
  0x28   : > { %p364_p10 = pnand %p363_p11, %p357_p12 }
  0x2a   : > { %367 = shalt.err (!%p364_p10)
}
  0x2b   : > { %s453_s4 = smov 128   ;;  %s454_s5 = smov 8  }
  0x2c   : > { %279 = dma.hbm_to_vmem [thread:$0]  (!%p535_p13), %s617_s0, 256, %s94_s23, [#allocation3], %s453_s4, %s453_s4, %s454_s5  }
  0x2d   : > { %p628_p0 = scmp.ne.s32.totalorder %s625_s20, 0 }
  0x2e   : > { %p629_p2 = scmp.ne.s32.totalorder (!%p628_p0), %s626_s21, 0 }
  0x2f   : > { %109 = sbr.rel (%p628_p0) target bundleno = 86 (0x56), region = 24 }
  0x36   : > { %421 = dma.done.wait (%p629_p2), [#allocation3], 256  }
  0x37   : > { %423 = vsyncadd (%p629_p2), [#allocation3], 4294967040  ;;  %s121_s15 = sand.u32 1, %s434_s7   ;;  %s245_s17 = sshll.u32 %s442_s9, 2 }
  0x38   : > { %s244_s22 = sshll.u32 %s121_s15, 3  ;;  %s128_s24 = ssub.s32 7, %s245_s17 }
  0x39   : > { %s123_s25 = scalar_lea.vmem [#allocation5], %s244_s22  ;;  %s269_s23 = sshll.u32 %s442_s9, 7 }
  0x3a   : > { %s162_s26 = sshll.u32 %s123_s25, 4  ;;  %s129_s27 = scalar_lea.vmem [#allocation2], %s128_s24  ;;  %s564_s26 = int_to_ptr.vmem [resolvable:$true] %s162_s26 }
  0x3b   : > { %v130_v0 = vld [vmem:[%s129_s27] ss:$4 sm:$0x3]  ;;  %v262_v1 = vld [vmem:[%s129_s27 - $0x1] ss:$4 sm:$0x3]  ;;  %s569_s28 = scalar_lea.hbm %s618_s1, %s269_s23 }
  0x3c   : > { %131 = vst [vmem:[%s123_s25] sm:$0x3] %v130_v0  ;;  %248 = vst [vmem:[%s123_s25 + $0x2] sm:$0x3] %v262_v1  ;;  %v265_v2 = vld [vmem:[%s129_s27 - $0x2] ss:$4 sm:$0x3] }
  0x3d   : > { %v268_v3 = vld [vmem:[%s129_s27 - $0x3] ss:$4 sm:$0x3]  ;;  %251 = vst [vmem:[%s123_s25 + $0x4] sm:$0x3] %v265_v2  ;;  %s571_s9 = scalar_lea.sflag [#allocation4], %s121_s15 }
  0x3e   : > { %254 = vst [vmem:[%s123_s25 + $0x6] sm:$0x3] %v268_v3  ;;  %s368_s29 = scalar_lea.vmem %s564_s26, 128  ;;  %p630_p8 = scmp.ne.s32.totalorder %s623_s16, 0 }
  0x3f   : > { %p369_p4 = scmp.ne.s32.totalorder %s564_s26, %s368_s29  ;;  %s455_s30 = smov [#allocation5]  }
  0x40   : > { %s372_s2 = sshll.u32 %s455_s30, 4  ;;  %s373_s2 = int_to_ptr.vmem [resolvable:$false] %s372_s2 }
  0x41   : > { %p370_p10 = pnand %p369_p4, %p630_p8  ;;  %s374_s3 = scalar_lea.vmem %s373_s2, 256 }
  0x42   : > { %p375_p13 = scmp.lt.s32.totalorder %s564_s26, %s373_s2  ;;  %p376_p1 = scmp.lt.s32.totalorder %s374_s3, %s368_s29 }
  0x43   : > { %p371_p11 = pneg %p370_p10 }
  0x44   : > { %p377_p3 = por %p376_p1, %p375_p13 }
  0x46   : > { %p378_p5 = pnand %p377_p3, %p371_p11 }
  0x48   : > { %381 = shalt.err (!%p378_p5)
}
  0x49   : > { %s382_s4 = scalar_lea.hbm %s569_s28, 128  ;;  %s386_s13 = scalar_lea.hbm %s618_s1, 256 }
  0x4a   : > { %p383_p6 = scmp.ne.s32.totalorder %s569_s28, %s382_s4  ;;  %p387_p12 = scmp.lt.u32.totalorder %s569_s28, %s618_s1 }
  0x4b   : > { %p388_p0 = scmp.lt.u32.totalorder %s386_s13, %s382_s4  ;;  %p390_p4 = scmp.lt.u32.totalorder %s382_s4, %s569_s28 }
  0x4c   : > { %p384_p7 = pnand %p383_p6, %p630_p8 }
  0x4d   : > { %p389_p2 = por %p388_p0, %p387_p12 }
  0x4e   : > { %p385_p9 = pneg %p384_p7 }
  0x4f   : > { %p391_p10 = por %p390_p4, %p389_p2 }
  0x51   : > { %p392_p11 = pnand %p391_p10, %p385_p9 }
  0x53   : > { %395 = shalt.err (!%p392_p11)
}
  0x54   : > { %s456_s22 = smov 32   ;;  %s457_s24 = smov 2  }
  0x55   : > { %274 = dma.vmem_to_hbm [thread:$0]  (%p630_p8), %s564_s26, 128, %s569_s28, %s571_s9, %s456_s22, %s456_s22, %s457_s24  }
  0x56 PF: > { %p286_p13 = scmp.ge.s32.totalorder %s450_s11, 2  ;;  %s177_s25 = sand.u32 1, %s430_s6  }
  0x57   : > { %p631_p1 = scmp.ne.s32.totalorder %s624_s18, 0  ;;  %s178_s23 = scalar_lea.sflag [#allocation4], %s177_s25 }
  0x59   : > { %p281_p3 = pnand %p286_p13, %p631_p1 }
  0x5b   : > { %425 = dma.done.wait (!%p281_p3), %s178_s23, 128  }
  0x5c   : > { %427 = vsyncadd (!%p281_p3), %s178_s23, 4294967168  ;;  %s15_s11 = sadd.s32 1, %s450_s11   ;;  %s632_s6 = smov %s434_s7 }
  0x5d   : > { %p12_p5 = scmp.ge.s32.totalorder %s15_s11, 4   ;;  %s633_s7 = smov %s438_s8 }
  0x5e   : > { %s634_s8 = smov %s521_s19  ;;  %s635_s9 = smov %s446_s10 }
  0x5f   : > { %s636_s10 = smov %s638_s14  ;;  %14 = sbr.rel (!%p12_p5) target bundleno = 5 (0x5), region = 68 }
  0x66   :  { %183 = vsyncpa [#allocation3], 1 }
  0x67   :  { %185 = vsyncpa [#allocation3 + $0x1], 1 }
  0x68   :  { %186 = vsyncpa [#allocation4], 1 }
  0x69   :  { %188 = vsyncpa [#allocation4 + $0x1], 1 }

// kernel: tpu_custom_call.1
= control target key start
LH: loop header
LB: loop body
LE: loop exit
PB: predicated region body
PF: predicated region fallthrough
CT: control target
= control target key end

     0   :  { %6 = vsyncpa [#allocation3], 0  ;;  %s618_s0 = inlined_call_operand.hbm [shape: f32[15,32], index: 0, kind: input, shape index: {}]   ;;  %s619_s1 = inlined_call_operand.hbm [shape: f32[8,8,32], index: 1, kind: output, shape index: {}]  }
   0x1   :  { %7 = vsyncpa [#allocation4], 0 }
   0x2   :  { %9 = vsyncpa [#allocation4 + $0x1], 0  ;;  %s469_s6 = smov 0   ;;  %s471_s7 = smov 0  }
   0x3   :  { %s473_s8 = smov 0   ;;  %s475_s9 = smov 0  }
   0x4   :  { %s477_s10 = smov 0   ;;  %s479_s11 = smov 0  }
   0x5 LB: > { %s239_s12 = sadd.s32 4294967295, %s451_s11   ;;  %s240_s13 = sadd.s32 4294967294, %s451_s11   ;;  %s451_s11 = sphi %s479_s11, %s15_s11   ;;  %s447_s10 = sphi %s477_s10, %s637_s10   ;;  %s443_s9 = sphi %s475_s9, %s636_s9   ;;  %s439_s8 = sphi %s473_s8, %s635_s8   ;;  %s435_s7 = sphi %s471_s7, %s634_s7   ;;  %s431_s6 = sphi %s469_s6, %s633_s6  }
   0x6   : > { %s27_s14 = sadd.s32 1, %s447_s10  ;;  %s57_s15 = sadd.s32 1, %s439_s8 }
   0x7   : > { %p29_p0 = scmp.ge.s32.totalorder %s27_s14, 2  ;;  %p67_p1 = scmp.ne.s32.totalorder %s439_s8, %s435_s7 }
   0x8   : > { %p68_p2 = scmp.eq.s32.totalorder %s239_s12, 1  ;;  %p73_p3 = scmp.ne.s32.totalorder %s435_s7, %s431_s6 }
   0x9   : > { %s639_s14 = smov (%p29_p0, %s27_s14), 0  ;;  %p74_p5 = scmp.eq.s32.totalorder %s240_s13, 1 }
   0xa   : > { %p509_p4 = por %p68_p2, %p67_p1  ;;  %s52_s17 = ssub.s32 %s447_s10, %s639_s14 }
   0xb   : > { %p241_p6 = scmp.ge.s32.totalorder %s451_s11, 1  ;;  %p55_p7 = scmp.eq.s32.totalorder %s52_s17, 0 }
   0xc   : > { %s624_s16 = scalar_select %p509_p4, 1, 0 }
   0xd   : > { %p516_p8 = por %p74_p5, %p73_p3  ;;  %p81_p9 = scmp.lt.s32.totalorder %s451_s11, 3 }
   0xe   : > { %s522_s19 = scalar_select %p55_p7, %s439_s8, %s57_s15  }
   0xf   : > { %s625_s18 = scalar_select %p516_p8, 1, 0 }
  0x10   : > { %p524_p10 = pnand %p241_p6, %p81_p9  ;;  %p528_p11 = scmp.eq.s32.totalorder %s239_s12, 0 }
  0x11   : > { %s453_s22 = smov [#allocation2]   ;;  %s341_s27 = scalar_lea.hbm %s618_s0, 256 }
  0x12   : > { %s626_s20 = scalar_select %p524_p10, 1, 0 }
  0x13   : > { %s627_s21 = scalar_select %p528_p11, 1, 0 }
  0x14   : > { %p277_p12 = pneg %p524_p10  ;;  %s93_s23 = sshll.u32 %s453_s22, 4  ;;  %s94_s23 = int_to_ptr.vmem [resolvable:$true] %s93_s23 }
  0x15   : > { %p342_p0 = scmp.ne.s32.totalorder %s618_s0, %s341_s27  ;;  %p348_p5 = scmp.lt.u32.totalorder %s341_s27, %s618_s0 }
  0x16   : > { %p536_p13 = pnand %p528_p11, %p277_p12 }
  0x18   : > { %p343_p1 = pneg %p536_p13 }
  0x1a   : > { %p344_p2 = pnand %p343_p1, %p342_p0 }
  0x1c   : > { %p345_p3 = pneg %p344_p2 }
  0x1e   : > { %p350_p6 = pnand %p348_p5, %p345_p3 }
  0x20   : > { %353 = shalt.err (!%p350_p6)
}
  0x21   : > { %s354_s3 = scalar_lea.vmem %s94_s23, 256  ;;  %p362_p8 = scmp.lt.s32.totalorder %s94_s23, %s94_s23 }
  0x22   : > { %p355_p7 = scmp.ne.s32.totalorder %s94_s23, %s354_s3  ;;  %p363_p4 = scmp.lt.s32.totalorder %s354_s3, %s354_s3 }
  0x24   : > { %p357_p9 = pnand %p355_p7, %p343_p1  ;;  %p364_p11 = por %p363_p4, %p362_p8 }
  0x26   : > { %p358_p12 = pneg %p357_p9 }
  0x28   : > { %p365_p10 = pnand %p364_p11, %p358_p12 }
  0x2a   : > { %368 = shalt.err (!%p365_p10)
}
  0x2b   : > { %s454_s4 = smov 128   ;;  %s455_s5 = smov 8  }
  0x2c   : > { %280 = dma.hbm_to_vmem [thread:$0]  (!%p536_p13), %s618_s0, 256, %s94_s23, [#allocation3], %s454_s4, %s454_s4, %s455_s5  }
  0x2d   : > { %p629_p0 = scmp.ne.s32.totalorder %s626_s20, 0 }
  0x2e   : > { %p630_p2 = scmp.ne.s32.totalorder (!%p629_p0), %s627_s21, 0 }
  0x2f   : > { %109 = sbr.rel (%p629_p0) target bundleno = 84 (0x54), region = 24 }
  0x36   : > { %422 = dma.done.wait (%p630_p2), [#allocation3], 256  }
  0x37   : > { %424 = vsyncadd (%p630_p2), [#allocation3], 4294967040  ;;  %s121_s15 = sand.u32 1, %s435_s7   ;;  %s246_s17 = sshll.u32 %s443_s9, 2  ;;  %vm131_vm0 = vcmask 261120  }
  0x38   : > { %s245_s22 = sshll.u32 %s121_s15, 5  ;;  %s128_s24 = ssub.s32 7, %s246_s17 }
  0x39   : > { %s123_s25 = scalar_lea.vmem [#allocation5], %s245_s22  ;;  %s270_s27 = sshll.u32 %s443_s9, 9 }
  0x3a   : > { %s163_s26 = sshll.u32 %s123_s25, 4  ;;  %s570_s21 = scalar_lea.hbm %s619_s1, %s270_s27  ;;  %s565_s26 = int_to_ptr.vmem [resolvable:$true] %s163_s26 }
  0x3b   : > { %s129_s28 = scalar_lea.vmem [#allocation2], %s128_s24  ;;  %s572_s9 = scalar_lea.sflag [#allocation4], %s121_s15 }
  0x3c   : > { %v130_v0 = vld [vmem:[%s129_s28] sm:$0xff]  ;;  %s369_s29 = scalar_lea.vmem %s565_s26, 512  ;;  %p631_p8 = scmp.ne.s32.totalorder %s624_s16, 0 }
  0x3d   : > { %v263_v1 = vld [vmem:[%s129_s28 - $0x1] sm:$0xff]  ;;  %132 = vst.msk [vmem:[%s123_s25] sm:$0xff] %vm131_vm0, %v130_v0  ;;  %p370_p4 = scmp.ne.s32.totalorder %s565_s26, %s369_s29  ;;  %s456_s30 = smov [#allocation5]  }
  0x3e   : > { %v266_v2 = vld [vmem:[%s129_s28 - $0x2] sm:$0xff]  ;;  %249 = vst.msk [vmem:[%s123_s25 + $0x8] sm:$0xff] %vm131_vm0, %v263_v1  ;;  %s373_s2 = sshll.u32 %s456_s30, 4  ;;  %s374_s2 = int_to_ptr.vmem [resolvable:$false] %s373_s2 }
  0x3f   : > { %252 = vst.msk [vmem:[%s123_s25 + $0x10] sm:$0xff] %vm131_vm0, %v266_v2  ;;  %v269_v3 = vld [vmem:[%s129_s28 - $0x3] sm:$0xff]  ;;  %p371_p10 = pnand %p370_p4, %p631_p8  ;;  %s375_s3 = scalar_lea.vmem %s374_s2, 1024 }
  0x40   : > { %255 = vst.msk [vmem:[%s123_s25 + $0x18] sm:$0xff] %vm131_vm0, %v269_v3  ;;  %p376_p13 = scmp.lt.s32.totalorder %s565_s26, %s374_s2  ;;  %p377_p1 = scmp.lt.s32.totalorder %s375_s3, %s369_s29 }
  0x41   : > { %p372_p11 = pneg %p371_p10 }
  0x42   : > { %p378_p3 = por %p377_p1, %p376_p13 }
  0x44   : > { %p379_p5 = pnand %p378_p3, %p372_p11 }
  0x46   : > { %382 = shalt.err (!%p379_p5)
}
  0x47   : > { %s383_s4 = scalar_lea.hbm %s570_s21, 512  ;;  %s387_s13 = scalar_lea.hbm %s619_s1, 1024 }
  0x48   : > { %p384_p6 = scmp.ne.s32.totalorder %s570_s21, %s383_s4  ;;  %p388_p12 = scmp.lt.u32.totalorder %s570_s21, %s619_s1 }
  0x49   : > { %p389_p0 = scmp.lt.u32.totalorder %s387_s13, %s383_s4  ;;  %p391_p4 = scmp.lt.u32.totalorder %s383_s4, %s570_s21 }
  0x4a   : > { %p385_p7 = pnand %p384_p6, %p631_p8 }
  0x4b   : > { %p390_p2 = por %p389_p0, %p388_p12 }
  0x4c   : > { %p386_p9 = pneg %p385_p7 }
  0x4d   : > { %p392_p10 = por %p391_p4, %p390_p2 }
  0x4f   : > { %p393_p11 = pnand %p392_p10, %p386_p9 }
  0x51   : > { %396 = shalt.err (!%p393_p11)
}
  0x52   : > { %s457_s22 = smov 128   ;;  %s458_s24 = smov 8  }
  0x53   : > { %275 = dma.vmem_to_hbm [thread:$0]  (%p631_p8), %s565_s26, 512, %s570_s21, %s572_s9, %s457_s22, %s457_s22, %s458_s24  }
  0x54 PF: > { %p287_p13 = scmp.ge.s32.totalorder %s451_s11, 2  ;;  %s178_s25 = sand.u32 1, %s431_s6  }
  0x55   : > { %p632_p1 = scmp.ne.s32.totalorder %s625_s18, 0  ;;  %s179_s27 = scalar_lea.sflag [#allocation4], %s178_s25 }
  0x57   : > { %p282_p3 = pnand %p287_p13, %p632_p1 }
  0x59   : > { %426 = dma.done.wait (!%p282_p3), %s179_s27, 512  }
  0x5a   : > { %428 = vsyncadd (!%p282_p3), %s179_s27, 4294966784  ;;  %s15_s11 = sadd.s32 1, %s451_s11   ;;  %s633_s6 = smov %s435_s7 }
  0x5b   : > { %p12_p5 = scmp.ge.s32.totalorder %s15_s11, 4   ;;  %s634_s7 = smov %s439_s8 }
  0x5c   : > { %s635_s8 = smov %s522_s19  ;;  %s636_s9 = smov %s447_s10 }
  0x5d   : > { %s637_s10 = smov %s639_s14  ;;  %14 = sbr.rel (!%p12_p5) target bundleno = 5 (0x5), region = 68 }
  0x64   :  { %184 = vsyncpa [#allocation3], 1 }
  0x65   :  { %186 = vsyncpa [#allocation3 + $0x1], 1 }
  0x66   :  { %187 = vsyncpa [#allocation4], 1 }
  0x67   :  { %189 = vsyncpa [#allocation4 + $0x1], 1 }

</bundles_post_ra>
